<compile_context>
chip_gen: v6e
topology: v6e:2x2x1
jax: 0.10.0
libtpu: 0.0.40
codegen_flags: <defaults>
</compile_context>

<pallas_src>
import functools
import math

import jax
import jax.numpy as jnp
from jax.experimental import pallas as pl
from jax.experimental.pallas import tpu as pltpu


def _attention_kernel(q_ref, k_ref, v_ref, *out_refs, block_h, e, d,
                      scale_tau, scale_delta, matmul_dtype, approx_recip,
                      output_attention):
    """One (batch, head-group, L-tile) grid step.

    q_ref: (TL, block_h*E)   k_ref: (S, block_h*E)   v_ref: (S, block_h*D)
    out_refs: v_out (TL, block_h*D) [, a_out (block_h, TL, S)]
    """
    if output_attention:
        v_out_ref, a_out_ref = out_refs
    else:
        (v_out_ref,) = out_refs
        a_out_ref = None

    q = q_ref[...]
    k = k_ref[...]
    v = v_ref[...]

    per_head_out = []
    for h in range(block_h):                      # block_h is small & static
        qh = q[:, h * e:(h + 1) * e].astype(matmul_dtype)
        kh = k[:, h * e:(h + 1) * e].astype(matmul_dtype)

        # scores (TL, S): contraction over E on the MXU, f32 accumulation.
        s = jax.lax.dot_general(qh, kh, (((1,), (1,)), ((), ())),
                                preferred_element_type=jnp.float32)
        s = s * scale_tau
        if scale_delta != 0.0:
            s = s + scale_delta

        # Numerically stable softmax over the key axis (f32); reciprocal on the EUP.
        m = jnp.max(s, axis=-1, keepdims=True)
        p = jnp.exp(s - m)
        denom = jnp.sum(p, axis=-1, keepdims=True)
        a = p * pl.reciprocal(denom, approx=approx_recip)

        # TODO(synk): nn.Dropout(p=0.05) is the eval-mode identity here; training-mode
        # dropout would build a keep-mask from pltpu.prng_seed / pltpu.prng_random_bits.
        if a_out_ref is not None:
            a_out_ref[h] = a.astype(a_out_ref.dtype)

        vh = v[:, h * d:(h + 1) * d].astype(matmul_dtype)
        per_head_out.append(jnp.dot(a.astype(matmul_dtype), vh,
                                    preferred_element_type=jnp.float32))

    # Lane-dense (TL, block_h*D) store; the consumer reshape to (..., H, D) is free.
    v_out_ref[...] = jnp.concatenate(per_head_out, axis=-1).astype(v_out_ref.dtype)


def _as_scalar(x, default, name):
    if x is None:
        return default
    if isinstance(x, (int, float)):
        return float(x)
    if getattr(x, "shape", None) == ():
        return float(x)
    # TODO(synk): tensor tau/delta (per-batch de-stationary factors) would be passed as
    # scalar-prefetch SMEM arrays indexed by the batch grid axis.
    raise NotImplementedError(f"tensor {name} not supported; pass None or a scalar")


def _pick_block_h(H, E, D):
    # Smallest divisor of H whose lane widths block_h*E and block_h*D are multiples of
    # 128 (lane-dense, minimal per-step VMEM residency); fall back to all heads
    # (full-extent blocks are always layout-legal).
    for bh in range(1, H + 1):
        if H % bh == 0 and (bh * E) % 128 == 0 and (bh * D) % 128 == 0:
            return bh
    return H


def _pick_block_l(L):
    for cand in (256, 128):       # amortize per-step overhead; fits v6e and v7x budgets
        if L % cand == 0:
            return cand
    return L


def attention_forward(queries, keys, values, tau=None, delta=None, *,
                      block_l=None, block_h=None, matmul_dtype=jnp.bfloat16,
                      output_attention=True):
    """Pallas TPU forward of the Attention module.

    queries: (B, L, H, E), keys: (B, S, H, E), values: (B, S, H, D).
    Returns (V, A) with V: (B, L, H, D); A: (B, H, L, S) or None.
    """
    B, L, H, E = queries.shape
    Bk, S, Hk, Ek = keys.shape
    Dv = values.shape[-1]
    assert (Bk, Hk, Ek) == (B, H, E) and values.shape[:3] == (B, S, H)

    scale = 1.0 / math.sqrt(E)
    tau_f = _as_scalar(tau, 1.0, "tau")
    delta_f = _as_scalar(delta, 0.0, "delta")
    # softmax argument = scale * (raw_scores * tau + delta)
    scale_tau = scale * tau_f
    scale_delta = scale * delta_f

    if block_h is None:
        block_h = _pick_block_h(H, E, Dv)
    assert H % block_h == 0, "block_h must divide H"
    if block_l is None:
        block_l = _pick_block_l(L)
    assert L % block_l == 0, "block_l must divide L"
    assert block_l % 8 == 0 or block_l == L, "block_l must be 8-aligned or equal L"

    n_g = H // block_h
    n_l = L // block_l

    # Free (contiguous) reshapes -- no extra HBM passes, unlike per-head transposes.
    q2 = queries.reshape(B, L, H * E)
    k2 = keys.reshape(B, S, H * E)
    v2 = values.reshape(B, S, H * Dv)

    out_dtype = queries.dtype
    a_dtype = queries.dtype            # bf16 inputs -> bf16 A writeback (half traffic)

    matmul_dtype = jnp.dtype(matmul_dtype)
    approx_recip = bool(matmul_dtype != jnp.dtype(jnp.float32))

    kernel = functools.partial(
        _attention_kernel, block_h=block_h, e=E, d=Dv,
        scale_tau=scale_tau, scale_delta=scale_delta,
        matmul_dtype=matmul_dtype, approx_recip=approx_recip,
        output_attention=output_attention)

    in_specs = [
        # Q tile: advances along the inner L axis, one head-group lane span.
        pl.BlockSpec((None, block_l, block_h * E), lambda b, g, l: (b, l, g)),
        # K / V: full-S slabs per head group; block index constant over l so they stay
        # VMEM-resident across the L tiles of a head group (no re-DMA).
        pl.BlockSpec((None, S, block_h * E), lambda b, g, l: (b, 0, g)),
        pl.BlockSpec((None, S, block_h * Dv), lambda b, g, l: (b, 0, g)),
    ]

    out_shapes = [jax.ShapeDtypeStruct((B, L, H * Dv), out_dtype)]
    out_specs = [pl.BlockSpec((None, block_l, block_h * Dv), lambda b, g, l: (b, l, g))]
    if output_attention:
        out_shapes.append(jax.ShapeDtypeStruct((B, H, L, S), a_dtype))
        out_specs.append(pl.BlockSpec((None, block_h, block_l, S),
                                      lambda b, g, l: (b, g, l, 0)))

    itemsize = jnp.dtype(queries.dtype).itemsize
    a_itemsize = jnp.dtype(a_dtype).itemsize
    # Double-buffered resident bytes per step (K/V slabs dominate); cap for v7x (64 MiB).
    resident = 2 * itemsize * block_h * (block_l * E + S * E + S * Dv + block_l * Dv)
    if output_attention:
        resident += 2 * a_itemsize * block_h * block_l * S
    vmem_limit = int(min(max(2 * resident, 32 * 1024 * 1024), 64 * 1024 * 1024))

    flops = 2 * B * H * L * S * (E + Dv)
    bytes_accessed = itemsize * (q2.size + k2.size + v2.size + B * L * H * Dv)
    if output_attention:
        bytes_accessed += a_itemsize * B * H * L * S
    cost = pl.CostEstimate(flops=int(flops), transcendentals=int(B * H * L * S),
                           bytes_accessed=int(bytes_accessed))

    results = pl.pallas_call(
        kernel,
        out_shape=tuple(out_shapes),
        grid_spec=pltpu.PrefetchScalarGridSpec(
            num_scalar_prefetch=0,
            grid=(B, n_g, n_l),            # inner L axis keeps K/V residency per (b, g)
            in_specs=in_specs,
            out_specs=tuple(out_specs),
        ),
        compiler_params=pltpu.CompilerParams(
            dimension_semantics=("parallel", "parallel", "parallel"),
            vmem_limit_bytes=vmem_limit),
        cost_estimate=cost,
    )(q2, k2, v2)

    if output_attention:
        v_out, a_out = results
    else:
        (v_out,) = results
        a_out = None

    V = v_out.reshape(B, L, H, Dv)        # free reshape, no HBM pass
    return V, a_out


def reference_forward(queries, keys, values):
    """Pure-JAX replica of the PyTorch forward (tau=1, delta=0, eval dropout)."""
    B, L, H, E = queries.shape
    scale = 1.0 / math.sqrt(E)
    scores = jnp.einsum('blhe,bshe->bhls', queries, keys)
    A = jax.nn.softmax(scale * scores, axis=-1)
    V = jnp.einsum('bhls,bshd->blhd', A, values)
    return V, A


if __name__ == "__main__":
    # Small shapes consistent with the module: B=2, L=S=8, H=4 heads, E=D=32.
    B, L, S, H, E, D = 2, 8, 8, 4, 32, 32

    key = jax.random.PRNGKey(0)
    kq, kk, kv = jax.random.split(key, 3)
    q = jax.random.normal(kq, (B, L, H, E), jnp.float32)
    k = jax.random.normal(kk, (B, S, H, E), jnp.float32)
    v = jax.random.normal(kv, (B, S, H, D), jnp.float32)

    V_ref, A_ref = reference_forward(q, k, v)

    # 1) Exact path (f32 MXU, exact reciprocal), explicit scalar tau/delta defaults.
    V32, A32 = attention_forward(q, k, v, tau=1.0, delta=0.0,
                                 matmul_dtype=jnp.float32)
    V32 = jax.block_until_ready(V32)
    A32 = jax.block_until_ready(A32)
    assert V32.shape == (B, L, H, D), V32.shape
    assert A32.shape == (B, H, L, S), A32.shape
    assert jnp.allclose(A32, A_ref, atol=1e-4, rtol=1e-4), "f32 attention weights mismatch"
    assert jnp.allclose(V32, V_ref, atol=1e-4, rtol=1e-4), "f32 attention output mismatch"

    # 2) Default fast path: bf16 MXU matmuls (f32 accumulate) + approx reciprocal.
    Vbf, Abf = attention_forward(q, k, v)
    Vbf = jax.block_until_ready(Vbf)
    Abf = jax.block_until_ready(Abf)
    assert jnp.allclose(Abf, A_ref, atol=5e-2, rtol=5e-2), "bf16 attention weights mismatch"
    assert jnp.allclose(Vbf, V_ref, atol=5e-2, rtol=5e-2), "bf16 attention output mismatch"

    # 3) output_attention=False skips the dominant A HBM writeback entirely.
    Vno, Ano = attention_forward(q, k, v, output_attention=False)
    Vno = jax.block_until_ready(Vno)
    assert Ano is None and Vno.shape == (B, L, H, D)

    print("KERNEL_OK")
</pallas_src>

<mosaic_0001>
module attributes {stable_mosaic.version = 11 : i64} {
  func.func @_attention_kernel(%arg0: i32, %arg1: i32, %arg2: i32, %arg3: memref<1x8x128xf32, #tpu.memory_space<vmem>>, %arg4: memref<1x8x128xf32, #tpu.memory_space<vmem>>, %arg5: memref<1x8x128xf32, #tpu.memory_space<vmem>>, %arg6: memref<1x8x128xf32, #tpu.memory_space<vmem>>, %arg7: memref<1x4x8x8xf32, #tpu.memory_space<vmem>>) attributes {dimension_semantics = [#tpu.dimension_semantics<parallel>, #tpu.dimension_semantics<parallel>, #tpu.dimension_semantics<parallel>], iteration_bounds = array<i64: 2, 1, 1>, scalar_prefetch = 0 : i64, scratch_operands = 0 : i64, tpu.core_type = #tpu.core_type<tc>, window_params = [{transform_indices = @transform_0, window_bounds = array<i64: 1, 8, 128>}, {transform_indices = @transform_1, window_bounds = array<i64: 1, 8, 128>}, {transform_indices = @transform_2, window_bounds = array<i64: 1, 8, 128>}, {transform_indices = @transform_3, window_bounds = array<i64: 1, 8, 128>}, {transform_indices = @transform_4, window_bounds = array<i64: 1, 4, 8, 8>}]} {
    %c0 = arith.constant 0 : index
    %c0_0 = arith.constant 0 : index
    %c0_1 = arith.constant 0 : index
    %0 = vector.load %arg3[%c0, %c0_0, %c0_1] : memref<1x8x128xf32, #tpu.memory_space<vmem>>, vector<1x8x128xf32>
    %1 = vector.shape_cast %0 : vector<1x8x128xf32> to vector<8x128xf32>
    %c0_2 = arith.constant 0 : index
    %c0_3 = arith.constant 0 : index
    %c0_4 = arith.constant 0 : index
    %2 = vector.load %arg4[%c0_2, %c0_3, %c0_4] : memref<1x8x128xf32, #tpu.memory_space<vmem>>, vector<1x8x128xf32>
    %3 = vector.shape_cast %2 : vector<1x8x128xf32> to vector<8x128xf32>
    %c0_5 = arith.constant 0 : index
    %c0_6 = arith.constant 0 : index
    %c0_7 = arith.constant 0 : index
    %4 = vector.load %arg5[%c0_5, %c0_6, %c0_7] : memref<1x8x128xf32, #tpu.memory_space<vmem>>, vector<1x8x128xf32>
    %5 = vector.shape_cast %4 : vector<1x8x128xf32> to vector<8x128xf32>
    %6 = vector.extract_strided_slice %1 {offsets = [0, 0], sizes = [8, 32], strides = [1, 1]} : vector<8x128xf32> to vector<8x32xf32>
    %7 = vector.extract_strided_slice %3 {offsets = [0, 0], sizes = [8, 32], strides = [1, 1]} : vector<8x128xf32> to vector<8x32xf32>
    %cst = arith.constant dense<0.000000e+00> : vector<8x8xf32>
    %8 = tpu.matmul %6, %7, %cst {dimension_numbers = #tpu.dot_dimension_numbers<[1], [1], [0], [0], [0, 0, 1, 0], [], []>} : vector<8x32xf32>, vector<8x32xf32>, vector<8x8xf32> -> vector<8x8xf32>
    %cst_8 = arith.constant 0.176776692 : f32
    %9 = vector.broadcast %cst_8 : f32 to vector<8x8xf32>
    %10 = arith.mulf %8, %9 : vector<8x8xf32>
    %cst_9 = arith.constant dense<0xFF800000> : vector<8xf32>
    %11 = vector.multi_reduction <maximumf>, %10, %cst_9 [1] : vector<8x8xf32> to vector<8xf32>
    %12 = vector.shape_cast %11 : vector<8xf32> to vector<8x1xf32>
    %13 = vector.broadcast %12 : vector<8x1xf32> to vector<8x8xf32>
    %14 = arith.subf %10, %13 : vector<8x8xf32>
    %15 = math.exp %14 : vector<8x8xf32>
    %cst_10 = arith.constant dense<0.000000e+00> : vector<8xf32>
    %16 = vector.multi_reduction <add>, %15, %cst_10 [1] : vector<8x8xf32> to vector<8xf32>
    %17 = vector.shape_cast %16 : vector<8xf32> to vector<8x1xf32>
    %18 = tpu.reciprocal %17 : vector<8x1xf32> -> vector<8x1xf32>
    %19 = vector.broadcast %18 : vector<8x1xf32> to vector<8x8xf32>
    %20 = arith.mulf %15, %19 : vector<8x8xf32>
    %c0_11 = arith.constant 0 : index
    %c0_12 = arith.constant 0 : index
    %c0_13 = arith.constant 0 : index
    %c0_14 = arith.constant 0 : index
    %21 = vector.load %arg7[%c0_11, %c0_12, %c0_13, %c0_14] : memref<1x4x8x8xf32, #tpu.memory_space<vmem>>, vector<1x1x8x8xf32>
    %22 = vector.shape_cast %21 : vector<1x1x8x8xf32> to vector<8x8xf32>
    %23 = vector.shape_cast %20 : vector<8x8xf32> to vector<1x1x8x8xf32>
    tpu.vector_store %arg7[%c0_11, %c0_12, %c0_13, %c0_14], %23 {strides = array<i32>} : memref<1x4x8x8xf32, #tpu.memory_space<vmem>>, vector<1x1x8x8xf32>,
    %24 = vector.extract_strided_slice %5 {offsets = [0, 0], sizes = [8, 32], strides = [1, 1]} : vector<8x128xf32> to vector<8x32xf32>
    %cst_15 = arith.constant dense<0.000000e+00> : vector<8x32xf32>
    %25 = tpu.matmul %20, %24, %cst_15 {dimension_numbers = #tpu.dot_dimension_numbers<[1], [0], [0], [1], [0, 0, 1, 1], [], []>} : vector<8x8xf32>, vector<8x32xf32>, vector<8x32xf32> -> vector<8x32xf32>
    %26 = vector.extract_strided_slice %1 {offsets = [0, 32], sizes = [8, 32], strides = [1, 1]} : vector<8x128xf32> to vector<8x32xf32>
    %27 = vector.extract_strided_slice %3 {offsets = [0, 32], sizes = [8, 32], strides = [1, 1]} : vector<8x128xf32> to vector<8x32xf32>
    %cst_16 = arith.constant dense<0.000000e+00> : vector<8x8xf32>
    %28 = tpu.matmul %26, %27, %cst_16 {dimension_numbers = #tpu.dot_dimension_numbers<[1], [1], [0], [0], [0, 0, 1, 0], [], []>} : vector<8x32xf32>, vector<8x32xf32>, vector<8x8xf32> -> vector<8x8xf32>
    %cst_17 = arith.constant 0.176776692 : f32
    %29 = vector.broadcast %cst_17 : f32 to vector<8x8xf32>
    %30 = arith.mulf %28, %29 : vector<8x8xf32>
    %cst_18 = arith.constant dense<0xFF800000> : vector<8xf32>
    %31 = vector.multi_reduction <maximumf>, %30, %cst_18 [1] : vector<8x8xf32> to vector<8xf32>
    %32 = vector.shape_cast %31 : vector<8xf32> to vector<8x1xf32>
    %33 = vector.broadcast %32 : vector<8x1xf32> to vector<8x8xf32>
    %34 = arith.subf %30, %33 : vector<8x8xf32>
    %35 = math.exp %34 : vector<8x8xf32>
    %cst_19 = arith.constant dense<0.000000e+00> : vector<8xf32>
    %36 = vector.multi_reduction <add>, %35, %cst_19 [1] : vector<8x8xf32> to vector<8xf32>
    %37 = vector.shape_cast %36 : vector<8xf32> to vector<8x1xf32>
    %38 = tpu.reciprocal %37 : vector<8x1xf32> -> vector<8x1xf32>
    %39 = vector.broadcast %38 : vector<8x1xf32> to vector<8x8xf32>
    %40 = arith.mulf %35, %39 : vector<8x8xf32>
    %c0_20 = arith.constant 0 : index
    %c1 = arith.constant 1 : index
    %c0_21 = arith.constant 0 : index
    %c0_22 = arith.constant 0 : index
    %41 = vector.load %arg7[%c0_20, %c1, %c0_21, %c0_22] : memref<1x4x8x8xf32, #tpu.memory_space<vmem>>, vector<1x1x8x8xf32>
    %42 = vector.shape_cast %41 : vector<1x1x8x8xf32> to vector<8x8xf32>
    %43 = vector.shape_cast %40 : vector<8x8xf32> to vector<1x1x8x8xf32>
    tpu.vector_store %arg7[%c0_20, %c1, %c0_21, %c0_22], %43 {strides = array<i32>} : memref<1x4x8x8xf32, #tpu.memory_space<vmem>>, vector<1x1x8x8xf32>,
    %44 = vector.extract_strided_slice %5 {offsets = [0, 32], sizes = [8, 32], strides = [1, 1]} : vector<8x128xf32> to vector<8x32xf32>
    %cst_23 = arith.constant dense<0.000000e+00> : vector<8x32xf32>
    %45 = tpu.matmul %40, %44, %cst_23 {dimension_numbers = #tpu.dot_dimension_numbers<[1], [0], [0], [1], [0, 0, 1, 1], [], []>} : vector<8x8xf32>, vector<8x32xf32>, vector<8x32xf32> -> vector<8x32xf32>
    %46 = vector.extract_strided_slice %1 {offsets = [0, 64], sizes = [8, 32], strides = [1, 1]} : vector<8x128xf32> to vector<8x32xf32>
    %47 = vector.extract_strided_slice %3 {offsets = [0, 64], sizes = [8, 32], strides = [1, 1]} : vector<8x128xf32> to vector<8x32xf32>
    %cst_24 = arith.constant dense<0.000000e+00> : vector<8x8xf32>
    %48 = tpu.matmul %46, %47, %cst_24 {dimension_numbers = #tpu.dot_dimension_numbers<[1], [1], [0], [0], [0, 0, 1, 0], [], []>} : vector<8x32xf32>, vector<8x32xf32>, vector<8x8xf32> -> vector<8x8xf32>
    %cst_25 = arith.constant 0.176776692 : f32
    %49 = vector.broadcast %cst_25 : f32 to vector<8x8xf32>
    %50 = arith.mulf %48, %49 : vector<8x8xf32>
    %cst_26 = arith.constant dense<0xFF800000> : vector<8xf32>
    %51 = vector.multi_reduction <maximumf>, %50, %cst_26 [1] : vector<8x8xf32> to vector<8xf32>
    %52 = vector.shape_cast %51 : vector<8xf32> to vector<8x1xf32>
    %53 = vector.broadcast %52 : vector<8x1xf32> to vector<8x8xf32>
    %54 = arith.subf %50, %53 : vector<8x8xf32>
    %55 = math.exp %54 : vector<8x8xf32>
    %cst_27 = arith.constant dense<0.000000e+00> : vector<8xf32>
    %56 = vector.multi_reduction <add>, %55, %cst_27 [1] : vector<8x8xf32> to vector<8xf32>
    %57 = vector.shape_cast %56 : vector<8xf32> to vector<8x1xf32>
    %58 = tpu.reciprocal %57 : vector<8x1xf32> -> vector<8x1xf32>
    %59 = vector.broadcast %58 : vector<8x1xf32> to vector<8x8xf32>
    %60 = arith.mulf %55, %59 : vector<8x8xf32>
    %c0_28 = arith.constant 0 : index
    %c2 = arith.constant 2 : index
    %c0_29 = arith.constant 0 : index
    %c0_30 = arith.constant 0 : index
    %61 = vector.load %arg7[%c0_28, %c2, %c0_29, %c0_30] : memref<1x4x8x8xf32, #tpu.memory_space<vmem>>, vector<1x1x8x8xf32>
    %62 = vector.shape_cast %61 : vector<1x1x8x8xf32> to vector<8x8xf32>
    %63 = vector.shape_cast %60 : vector<8x8xf32> to vector<1x1x8x8xf32>
    tpu.vector_store %arg7[%c0_28, %c2, %c0_29, %c0_30], %63 {strides = array<i32>} : memref<1x4x8x8xf32, #tpu.memory_space<vmem>>, vector<1x1x8x8xf32>,
    %64 = vector.extract_strided_slice %5 {offsets = [0, 64], sizes = [8, 32], strides = [1, 1]} : vector<8x128xf32> to vector<8x32xf32>
    %cst_31 = arith.constant dense<0.000000e+00> : vector<8x32xf32>
    %65 = tpu.matmul %60, %64, %cst_31 {dimension_numbers = #tpu.dot_dimension_numbers<[1], [0], [0], [1], [0, 0, 1, 1], [], []>} : vector<8x8xf32>, vector<8x32xf32>, vector<8x32xf32> -> vector<8x32xf32>
    %66 = vector.extract_strided_slice %1 {offsets = [0, 96], sizes = [8, 32], strides = [1, 1]} : vector<8x128xf32> to vector<8x32xf32>
    %67 = vector.extract_strided_slice %3 {offsets = [0, 96], sizes = [8, 32], strides = [1, 1]} : vector<8x128xf32> to vector<8x32xf32>
    %cst_32 = arith.constant dense<0.000000e+00> : vector<8x8xf32>
    %68 = tpu.matmul %66, %67, %cst_32 {dimension_numbers = #tpu.dot_dimension_numbers<[1], [1], [0], [0], [0, 0, 1, 0], [], []>} : vector<8x32xf32>, vector<8x32xf32>, vector<8x8xf32> -> vector<8x8xf32>
    %cst_33 = arith.constant 0.176776692 : f32
    %69 = vector.broadcast %cst_33 : f32 to vector<8x8xf32>
    %70 = arith.mulf %68, %69 : vector<8x8xf32>
    %cst_34 = arith.constant dense<0xFF800000> : vector<8xf32>
    %71 = vector.multi_reduction <maximumf>, %70, %cst_34 [1] : vector<8x8xf32> to vector<8xf32>
    %72 = vector.shape_cast %71 : vector<8xf32> to vector<8x1xf32>
    %73 = vector.broadcast %72 : vector<8x1xf32> to vector<8x8xf32>
    %74 = arith.subf %70, %73 : vector<8x8xf32>
    %75 = math.exp %74 : vector<8x8xf32>
    %cst_35 = arith.constant dense<0.000000e+00> : vector<8xf32>
    %76 = vector.multi_reduction <add>, %75, %cst_35 [1] : vector<8x8xf32> to vector<8xf32>
    %77 = vector.shape_cast %76 : vector<8xf32> to vector<8x1xf32>
    %78 = tpu.reciprocal %77 : vector<8x1xf32> -> vector<8x1xf32>
    %79 = vector.broadcast %78 : vector<8x1xf32> to vector<8x8xf32>
    %80 = arith.mulf %75, %79 : vector<8x8xf32>
    %c0_36 = arith.constant 0 : index
    %c3 = arith.constant 3 : index
    %c0_37 = arith.constant 0 : index
    %c0_38 = arith.constant 0 : index
    %81 = vector.load %arg7[%c0_36, %c3, %c0_37, %c0_38] : memref<1x4x8x8xf32, #tpu.memory_space<vmem>>, vector<1x1x8x8xf32>
    %82 = vector.shape_cast %81 : vector<1x1x8x8xf32> to vector<8x8xf32>
    %83 = vector.shape_cast %80 : vector<8x8xf32> to vector<1x1x8x8xf32>
    tpu.vector_store %arg7[%c0_36, %c3, %c0_37, %c0_38], %83 {strides = array<i32>} : memref<1x4x8x8xf32, #tpu.memory_space<vmem>>, vector<1x1x8x8xf32>,
    %84 = vector.extract_strided_slice %5 {offsets = [0, 96], sizes = [8, 32], strides = [1, 1]} : vector<8x128xf32> to vector<8x32xf32>
    %cst_39 = arith.constant dense<0.000000e+00> : vector<8x32xf32>
    %85 = tpu.matmul %80, %84, %cst_39 {dimension_numbers = #tpu.dot_dimension_numbers<[1], [0], [0], [1], [0, 0, 1, 1], [], []>} : vector<8x8xf32>, vector<8x32xf32>, vector<8x32xf32> -> vector<8x32xf32>
    %86 = tpu.concatenate %25, %45, %65, %85 in 1 : vector<8x32xf32>, vector<8x32xf32>, vector<8x32xf32>, vector<8x32xf32> -> vector<8x128xf32>
    %c0_40 = arith.constant 0 : index
    %c0_41 = arith.constant 0 : index
    %c0_42 = arith.constant 0 : index
    %87 = vector.load %arg6[%c0_40, %c0_41, %c0_42] : memref<1x8x128xf32, #tpu.memory_space<vmem>>, vector<1x8x128xf32>
    %88 = vector.shape_cast %87 : vector<1x8x128xf32> to vector<8x128xf32>
    %89 = vector.shape_cast %86 : vector<8x128xf32> to vector<1x8x128xf32>
    tpu.vector_store %arg6[%c0_40, %c0_41, %c0_42], %89 {strides = array<i32>} : memref<1x8x128xf32, #tpu.memory_space<vmem>>, vector<1x8x128xf32>,
    return
  }
  func.func @transform_0(%arg0: i32, %arg1: i32, %arg2: i32) -> (i32, i32, i32) {
    %c0_i32 = arith.constant 0 : i32
    return %arg0, %arg2, %arg1 : i32, i32, i32
  }
  func.func @transform_1(%arg0: i32, %arg1: i32, %arg2: i32) -> (i32, i32, i32) {
    %c0_i32 = arith.constant 0 : i32
    %c0_i32_0 = arith.constant 0 : i32
    return %arg0, %c0_i32, %arg1 : i32, i32, i32
  }
  func.func @transform_2(%arg0: i32, %arg1: i32, %arg2: i32) -> (i32, i32, i32) {
    %c0_i32 = arith.constant 0 : i32
    %c0_i32_0 = arith.constant 0 : i32
    return %arg0, %c0_i32, %arg1 : i32, i32, i32
  }
  func.func @transform_3(%arg0: i32, %arg1: i32, %arg2: i32) -> (i32, i32, i32) {
    %c0_i32 = arith.constant 0 : i32
    return %arg0, %arg2, %arg1 : i32, i32, i32
  }
  func.func @transform_4(%arg0: i32, %arg1: i32, %arg2: i32) -> (i32, i32, i32, i32) {
    %c0_i32 = arith.constant 0 : i32
    %c0_i32_0 = arith.constant 0 : i32
    return %arg0, %arg1, %arg2, %c0_i32 : i32, i32, i32, i32
  }
}

</mosaic_0001>

<bundles_post_ra>
// kernel: tpu_custom_call.1
= control target key start
LH: loop header
LB: loop body
LE: loop exit
PB: predicated region body
PF: predicated region fallthrough
CT: control target
= control target key end

     0   :  { %s1976_s0 = inlined_call_operand.hbm [shape: f32[2,8,128], index: 0, kind: input, shape index: {}]   ;;  %s1977_s1 = inlined_call_operand.hbm [shape: f32[2,8,128], index: 1, kind: input, shape index: {}]   ;;  %s1978_s2 = inlined_call_operand.hbm [shape: f32[2,8,128], index: 2, kind: input, shape index: {}]   ;;  %s1979_s3 = inlined_call_operand.hbm [shape: f32[2,8,128], index: 3, kind: output, shape index: {0}]   ;;  %s1980_s4 = inlined_call_operand.hbm [shape: f32[2,4,8,8], index: 4, kind: output, shape index: {1}]  }
   0x1   :  { %1984 = sst [smem:[#allocation18_spill]] %s1977_s1 }
   0x2   :  { %10 = vsyncpa [#allocation3], 0 }
   0x3   :  { %12 = vsyncpa [#allocation3 + $0x1], 0 }
   0x4   :  { %13 = vsyncpa [#allocation6], 0 }
   0x5   :  { %15 = vsyncpa [#allocation6 + $0x1], 0 }
   0x6   :  { %16 = vsyncpa [#allocation4], 0 }
   0x7   :  { %18 = vsyncpa [#allocation4 + $0x1], 0 }
   0x8   :  { %19 = vsyncpa [#allocation10], 0 }
   0x9   :  { %21 = vsyncpa [#allocation10 + $0x1], 0  ;;  %s1663_s15 = smov 0   ;;  %s1665_s16 = smov 0  }
   0xa   :  { %s1667_s17 = smov 0   ;;  %s1669_s18 = smov 0  }
   0xb   :  { %s1671_s19 = smov 0   ;;  %s1673_s20 = smov 0  }
   0xc LB: > { %1985 = sst [smem:[#allocation15_spill]] %s1620_s19  ;;  %s1694_s21 = sadd.s32 4294967295, %s1624_s20   ;;  %s1624_s20 = sphi %s1673_s20, %s27_s20   ;;  %s1620_s19 = sphi %s1671_s19, %s1999_s19   ;;  %s1616_s18 = sphi %s1669_s18, %s1998_s18   ;;  %s1612_s17 = sphi %s1667_s17, %s2002_s17   ;;  %s1608_s16 = sphi %s1665_s16, %s2001_s16   ;;  %s1604_s15 = sphi %s1663_s15, %s2000_s15  }
   0xd   : > { %s1232_s22 = sadd.s32 4294967294, %s1624_s20   ;;  %s46_s23 = sadd.s32 1, %s1620_s19 }
   0xe   : > { %s57_s24 = sadd.s32 1, %s1612_s17  ;;  %p48_p0 = scmp.ge.s32.totalorder %s46_s23, 2 }
   0xf   : > { %p64_p1 = scmp.ne.s32.totalorder %s1612_s17, %s1608_s16  ;;  %p65_p2 = scmp.eq.s32.totalorder %s1624_s20, 0 }
  0x10   : > { %p70_p3 = scmp.ne.s32.totalorder %s1608_s16, %s1604_s15  ;;  %s2004_s23 = smov (%p48_p0, %s46_s23), 0 }
  0x11   : > { %1986 = sst [smem:[#allocation16_spill]] %s2004_s23  ;;  %p1706_p4 = por %p65_p2, %p64_p1 }
  0x12   : > { %p71_p5 = scmp.eq.s32.totalorder %s1694_s21, 0  ;;  %s50_s26 = ssub.s32 %s1620_s19, %s2004_s23 }
  0x13   : > { %p154_p6 = scmp.eq.s32.totalorder %s1694_s21, 1  ;;  %p55_p7 = scmp.eq.s32.totalorder %s50_s26, 0 }
  0x14   : > { %p1714_p8 = por %p71_p5, %p70_p3  ;;  %p160_p10 = scmp.eq.s32.totalorder %s1232_s22, 1 }
  0x15   : > { %p1718_p9 = por %p154_p6, %p64_p1  ;;  %p1353_p13 = scmp.lt.s32.totalorder %s1624_s20, 2 }
  0x16   : > { %s1723_s29 = scalar_select %p55_p7, %s1612_s17, %s57_s24  }
  0x17   : > { %p1725_p11 = por %p160_p10, %p70_p3  ;;  %s1981_s5 = sand.u32 1, %s1612_s17  }
  0x18   : > { %1990 = sst [smem:[#allocation17_spill]] %s1723_s29  ;;  %s1734_s6 = sshll.u32 %s1981_s5, 3 }
  0x19   : > { %s1737_s7 = sshll.u32 %s1620_s19, 7  ;;  %p1741_p0 = pnand %p1353_p13, %p1706_p4 }
  0x1a   : > { %s230_s9 = sand.u32 1, %s1624_s20   ;;  %s1993_s1 = sld [smem:[#allocation18_spill]] }
  0x1b   : > { %s234_s13 = scalar_lea.vmem [#allocation5], %s1734_s6  ;;  %p1241_p1 = scmp.ge.s32.totalorder %s1624_s20, 1 }
  0x1c   : > { %s242_s14 = sshll.u32 %s234_s13, 4  ;;  %p266_p2 = scmp.lt.s32.totalorder %s1624_s20, 3  ;;  %s243_s14 = int_to_ptr.vmem [resolvable:$true] %s242_s14 }
  0x1d   : > { %s1753_s22 = scalar_lea.sflag [#allocation6], %s230_s9  ;;  %p1428_p3 = pneg %p1741_p0 }
  0x1e   : > { %s1439_s24 = scalar_lea.vmem %s243_s14, 128  ;;  %s1626_s25 = smov [#allocation5]  }
  0x1f   : > { %p1440_p4 = scmp.ne.s32.totalorder %s243_s14, %s1439_s24  ;;  %s1444_s26 = sshll.u32 %s1626_s25, 4  ;;  %s1445_s26 = int_to_ptr.vmem [resolvable:$false] %s1444_s26 }
  0x20   : > { %s240_s12 = scalar_lea.hbm %s1993_s1, %s1737_s7  ;;  %s1446_s10 = scalar_lea.vmem %s1445_s26, 256 }
  0x21   : > { %p1442_p5 = pnand %p1440_p4, %p1428_p3  ;;  %p1447_p7 = scmp.lt.s32.totalorder %s243_s14, %s1445_s26 }
  0x22   : > { %p1448_p10 = scmp.lt.s32.totalorder %s1446_s10, %s1439_s24 }
  0x23   : > { %p1443_p6 = pneg %p1442_p5 }
  0x24   : > { %p1449_p13 = por %p1448_p10, %p1447_p7 }
  0x26   : > { %p1450_p12 = pnand %p1449_p13, %p1443_p6 }
  0x28   : > { %1453 = shalt.err (!%p1450_p12)
}
  0x29   : > { %1342 = dma.hbm_to_vmem [thread:$0]  (!%p1741_p0), %s240_s12, 128, %s243_s14, %s1753_s22  }
  0x2a   : > { %p1767_p4 = pnand %p1241_p1, %p266_p2  ;;  %s221_s24 = scalar_lea.hbm %s1976_s0, %s1737_s7 }
  0x2b   : > { %s214_s25 = scalar_lea.vmem [#allocation2], %s1734_s6  ;;  %s259_s1 = scalar_lea.hbm %s1978_s2, %s1737_s7 }
  0x2c   : > { %s223_s26 = sshll.u32 %s214_s25, 4  ;;  %s1995_s23 = sand.u32 1, %s1612_s17   ;;  %s224_s26 = int_to_ptr.vmem [resolvable:$true] %s223_s26 }
  0x2d   : > { %s211_s19 = scalar_lea.sflag [#allocation3], %s1995_s23  ;;  %s1467_s12 = scalar_lea.vmem %s224_s26, 128 }
  0x2e   : > { %p1468_p12 = scmp.ne.s32.totalorder %s224_s26, %s1467_s12  ;;  %s1627_s14 = smov [#allocation2]  }
  0x2f   : > { %s1472_s29 = sshll.u32 %s1627_s14, 4  ;;  %s1473_s29 = int_to_ptr.vmem [resolvable:$false] %s1472_s29 }
  0x30   : > { %p1470_p1 = pnand %p1468_p12, %p1428_p3  ;;  %s1474_s11 = scalar_lea.vmem %s1473_s29, 256 }
  0x31   : > { %p1475_p5 = scmp.lt.s32.totalorder %s224_s26, %s1473_s29  ;;  %p1476_p6 = scmp.lt.s32.totalorder %s1474_s11, %s1467_s12 }
  0x32   : > { %p1471_p2 = pneg %p1470_p1 }
  0x33   : > { %p1477_p7 = por %p1476_p6, %p1475_p5 }
  0x35   : > { %p1478_p10 = pnand %p1477_p7, %p1471_p2 }
  0x37   : > { %1481 = shalt.err (!%p1478_p10)
}
  0x38   : > { %1339 = dma.hbm_to_vmem [thread:$0]  (!%p1741_p0), %s221_s24, 128, %s224_s26, %s211_s19  }
  0x39   : > { %s253_s23 = scalar_lea.vmem [#allocation7], %s1734_s6  ;;  %s1628_s25 = smov [#allocation7]  }
  0x3a   : > { %s261_s5 = sshll.u32 %s253_s23, 4  ;;  %s1500_s29 = sshll.u32 %s1628_s25, 4  ;;  %s262_s5 = int_to_ptr.vmem [resolvable:$true] %s261_s5  ;;  %s1501_s29 = int_to_ptr.vmem [resolvable:$false] %s1500_s29 }
  0x3b   : > { %s1495_s13 = scalar_lea.vmem %s262_s5, 128  ;;  %s1502_s10 = scalar_lea.vmem %s1501_s29, 256 }
  0x3c   : > { %p1496_p13 = scmp.ne.s32.totalorder %s262_s5, %s1495_s13  ;;  %p1503_p2 = scmp.lt.s32.totalorder %s262_s5, %s1501_s29 }
  0x3d   : > { %p1504_p5 = scmp.lt.s32.totalorder %s1502_s10, %s1495_s13 }
  0x3e   : > { %p1498_p12 = pnand %p1496_p13, %p1428_p3 }
  0x3f   : > { %p1505_p6 = por %p1504_p5, %p1503_p2 }
  0x40   : > { %p1499_p1 = pneg %p1498_p12 }
  0x42   : > { %p1506_p7 = pnand %p1505_p6, %p1499_p1 }
  0x44   : > { %1509 = shalt.err (!%p1506_p7)
}
  0x45   : > { %1345 = dma.hbm_to_vmem [thread:$0]  (!%p1741_p0), %s259_s1, 128, %s262_s5, %s1753_s22  }
  0x46   : > { %270 = sbr.rel (%p1767_p4) target bundleno = 1478 (0x5c6), region = 32  ;;  %s1802_s24 = sand.u32 (!%p1767_p4), 1, %s1608_s16  }
  0x47   : > { %s1805_s26 = sshll.u32 (!%p1767_p4), %s1802_s24, 3  ;;  %s273_s8 = scalar_lea.sflag (!%p1767_p4), [#allocation3], %s1802_s24 }
  0x48   : > { %s276_s12 = scalar_lea.vmem (!%p1767_p4), [#allocation2], %s1805_s26 }
  0x4b   : > { %1587 = dma.done.wait (%p1714_p8), %s273_s8, 128  }
  0x4c   : > { %1589 = vsyncadd (%p1714_p8), %s273_s8, 4294967168  ;;  %s281_s1 = sand.u32 1, %s1694_s21   ;;  %s285_s22 = scalar_lea.vmem [#allocation5], %s1805_s26 }
  0x4d   : > { %s282_s7 = scalar_lea.sflag [#allocation6], %s281_s1 }
  0x4e   : > { %1591 = dma.done.wait (%p1714_p8), %s282_s7, 256  }
  0x4f   : > { %1593 = vsyncadd (%p1714_p8), %s282_s7, 4294967040  ;;  %v1629_v0 = vmov 0.0   ;;  %vm1630_vm0 = vmmov 0   ;;  %vm338_vm1 = vcmask 261120   ;;  %v336_v1 = vld [vmem:[%s285_s22] sm:$0xff]  ;;  %v335_v2 = vld [vmem:[%s276_s12] sm:$0xff] }
  0x50   : > { %1286 = vmatprep.subr.mxu0 %v1629_v0  ;;  %1288 = vmatprep.mubr.msk.f32.mxu0 %vm1630_vm0, %v1629_v0  ;;  %vm416_vm2 = vcmask 64512   ;;  %s1631_s21 = smov 96   ;;  %s1632_s27 = smov 64  }
  0x51   : > { %1291 = vmatprep.subr.mxu1 %v1629_v0  ;;  %1293 = vmatprep.mubr.msk.f32.mxu1 %vm1630_vm0, %v1629_v0  ;;  %s1633_s9 = smov 32   ;;  %s294_s14 = scalar_lea.vmem [#allocation7], %s1805_s26 }
  0x52   : > { %1287 = vmatpush3.xpose.msk.msra.mxu0 %vm338_vm1, %v336_v1  ;;  %504 = vrot.lane.b32.xlu1 %v336_v1, %s1631_s21  ;;  %v1838_v12 = vld [vmem:[%s294_s14] sm:$0xff]  ;;  %s1246_s11 = sshll.u32 %s1802_s24, 5  ;;  %s1269_s5 = sshll.u32 %s1616_s18, 9 }
  0x53   : > { %1301 = vmatprep.subr.mxu0 %v1629_v0  ;;  %1292 = vmatpush3.msra.mxu1 %v1838_v12  ;;  %s1844_s23 = scalar_lea.vmem [#allocation9], %s1246_s11  ;;  %s1899_s10 = scalar_lea.hbm %s1980_s4, %s1269_s5 }
  0x54   : > { %1296 = vmatprep.subr.mxu1 %v1629_v0  ;;  %s1062_s13 = sshll.u32 %s1844_s23, 4  ;;  %s1031_s19 = scalar_lea.sflag [#allocation10], %s1802_s24  ;;  %s1901_s13 = int_to_ptr.vmem [resolvable:$true] %s1062_s13 }
  0x55   : > { %1289 = vmatmul.mubr.msk.f32.vlgmr.msra.gmra.mxu0 %vm338_vm1, %v335_v2  ;;  %s1510_s6 = scalar_lea.vmem %s1901_s13, 512  ;;  %s1634_s8 = smov [#allocation9]  }
  0x56   : > { %1303 = vmatprep.mubr.msk.f32.mxu0 %vm1630_vm0, %v1629_v0  ;;  %502 = vrot.lane.b32.xlu1 %v335_v2, %s1631_s21  ;;  %p1511_p8 = scmp.ne.s32.totalorder %s1901_s13, %s1510_s6  ;;  %s1514_s12 = sshll.u32 %s1634_s8, 4  ;;  %s1515_s12 = int_to_ptr.vmem [resolvable:$false] %s1514_s12 }
  0x57   : > { %s1516_s1 = scalar_lea.vmem %s1515_s12, 1024  ;;  %p1517_p4 = scmp.lt.s32.totalorder %s1901_s13, %s1515_s12 }
  0x58   : > { %p1512_p0 = pnand %p1511_p8, %p1718_p9  ;;  %p1518_p10 = scmp.lt.s32.totalorder %s1516_s1, %s1510_s6 }
  0x5a   : > { %671 = vrot.lane.b32.xlu1 %v335_v2, %s1632_s27  ;;  %p1513_p3 = pneg %p1512_p0  ;;  %p1519_p13 = por %p1518_p10, %p1517_p4 }
  0x5c   : > { %p1520_p12 = pnand %p1519_p13, %p1513_p3 }
  0x5e   : > { %841 = vrot.lane.b32.xlu1 %v336_v1, %s1633_s9 }
  0x62   : > { %839 = vrot.lane.b32.xlu1 %v335_v2, %s1633_s9 }
  0xc4   : > { %v505_v14 = vpop.permute.xlu1 %504 }
  0xc8   : > { %v503_v15 = vpop.permute.xlu1 %502 }
  0xcc   : > { %v672_v17 = vpop.permute.xlu1 %671 }
  0xd0   : > { %v842_v20 = vpop.permute.xlu1 %841 }
  0xd4   : > { %v840_v21 = vpop.permute.xlu1 %839 }
 0x115   : > { %v411_v3 = vpop.f32.mrf.mxu0 }
 0x116   : > { %v415_v4 = vmul.f32 0.17677669, %v411_v3 }
 0x117   : > { %v1290_v5 = vpop.f32.mrf.mxu0 }
 0x118   : > { %v417_v6 = vsel %vm416_vm2, %v415_v4, -inf }
 0x119   : > { %418 = vmax.xlane.f32.xlu0 %v417_v6 }
 0x1a2   : > { %v419_v7 = vpop.xlane.xlu0 %418 }
 0x1a3   : > { %v420_v8 = vsub.f32 %v415_v4, %v419_v7 }
 0x1a5   : > { %v421_v9 = vmul.f32 1.442695, %v420_v8 }
 0x1a7   : > { %1410 = vpow2.f32 %v421_v9 }
 0x1b4   : > { %v1411_v10 = vpop.eup %1410 }
 0x1b5   : > { %v423_v11 = vsel %vm416_vm2, %v1411_v10, 0.0 }
 0x1b6   : > { %424 = vadd.xlane.f32.xlu0 %v423_v11 }
 0x1cc   : > { %673 = vrot.lane.b32.xlu0 %v336_v1, %s1632_s27 }
 0x23f   : > { %v425_v13 = vpop.xlane.xlu0 %424 }
 0x240   : > { %1412 = vrcp.f32 %v425_v13 }
 0x243   : > { %v674_v19 = vpop.permute.xlu0 %673 }
 0x24d   : > { %v1413_v16 = vpop.eup %1412 }
 0x24e   : > { %v427_v18 = vmul.f32 %v1413_v16, %v1411_v10 }
 0x250   : > { %428 = vst.msk [vmem:[%s1844_s23] sm:$0xff] %vm416_vm2, %v427_v18  ;;  %1294 = vmatmul.mubr.msk.f32.vlgmr.msra.gmra.mxu1 %vm416_vm2, %v427_v18 }
 0x251   : > { %1297 = vmatpush3.xpose.msk.msra.mxu1 %vm338_vm1, %v505_v14  ;;  %1298 = vmatprep.mubr.msk.f32.mxu1 %vm1630_vm0, %v1629_v0 }
 0x252   : > { %1306 = vmatprep.subr.mxu1 %v1629_v0 }
 0x254   : > { %1299 = vmatmul.mubr.msk.f32.vlgmr.msra.gmra.mxu1 %vm338_vm1, %v503_v15 }
 0x255   : > { %1307 = vmatpush3.xpose.msk.msra.mxu1 %vm338_vm1, %v674_v19  ;;  %1308 = vmatprep.mubr.msk.f32.mxu1 %vm1630_vm0, %v1629_v0 }
 0x256   : > { %1316 = vmatprep.subr.mxu1 %v1629_v0 }
 0x258   : > { %1309 = vmatmul.mubr.msk.f32.vlgmr.msra.gmra.mxu1 %vm338_vm1, %v672_v17 }
 0x259   : > { %1317 = vmatpush3.xpose.msk.msra.mxu1 %vm338_vm1, %v842_v20  ;;  %1318 = vmatprep.mubr.msk.f32.mxu1 %vm1630_vm0, %v1629_v0 }
 0x25c   : > { %1319 = vmatmul.mubr.msk.f32.vlgmr.msra.gmra.mxu1 %vm338_vm1, %v840_v21 }
 0x310   : > { %v1863_v22 = vpop.f32.mrf.mxu1 }
 0x312   : > { %v1295_v23 = vpop.f32.mrf.mxu1 }
 0x314   : > { %v576_v24 = vpop.f32.mrf.mxu1 }
 0x315   : > { %v580_v25 = vmul.f32 0.17677669, %v576_v24 }
 0x316   : > { %v1300_v26 = vpop.f32.mrf.mxu1 }
 0x317   : > { %v581_v27 = vsel %vm416_vm2, %v580_v25, -inf }
 0x318   : > { %582 = vmax.xlane.f32.xlu1 %v581_v27  ;;  %v745_v28 = vpop.f32.mrf.mxu1 }
 0x319   : > { %v749_v29 = vmul.f32 0.17677669, %v745_v28 }
 0x31a   : > { %v1310_v30 = vpop.f32.mrf.mxu1 }
 0x31b   : > { %v750_v31 = vsel %vm416_vm2, %v749_v29, -inf }
 0x31c   : > { %751 = vmax.xlane.f32.xlu0 %v750_v31  ;;  %v913_v32 = vpop.f32.mrf.mxu1 }
 0x31d   : > { %v917_v33 = vmul.f32 0.17677669, %v913_v32 }
 0x31e   : > { %v1320_v34 = vpop.f32.mrf.mxu1 }
 0x31f   : > { %v918_v35 = vsel %vm416_vm2, %v917_v33, -inf }
 0x320   : > { %919 = vmax.xlane.f32.xlu1 %v918_v35 }
 0x3a1   : > { %v583_v36 = vpop.xlane.xlu1 %582 }
 0x3a2   : > { %v584_v37 = vsub.f32 %v580_v25, %v583_v36 }
 0x3a4   : > { %v585_v38 = vmul.f32 1.442695, %v584_v37 }
 0x3a5   : > { %v752_v39 = vpop.xlane.xlu0 %751 }
 0x3a6   : > { %1414 = vpow2.f32 %v585_v38  ;;  %v753_v40 = vsub.f32 %v749_v29, %v752_v39 }
 0x3a8   : > { %v754_v41 = vmul.f32 1.442695, %v753_v40 }
 0x3a9   : > { %v920_v46 = vpop.xlane.xlu1 %919 }
 0x3aa   : > { %1416 = vpow2.f32 %v754_v41  ;;  %v921_v47 = vsub.f32 %v917_v33, %v920_v46 }
 0x3ac   : > { %v922_v48 = vmul.f32 1.442695, %v921_v47 }
 0x3ae   : > { %1418 = vpow2.f32 %v922_v48 }
 0x3b3   : > { %v1415_v42 = vpop.eup %1414 }
 0x3b4   : > { %v587_v43 = vsel %vm416_vm2, %v1415_v42, 0.0 }
 0x3b5   : > { %588 = vadd.xlane.f32.xlu1 %v587_v43 }
 0x3b7   : > { %v1417_v44 = vpop.eup %1416 }
 0x3b8   : > { %v756_v45 = vsel %vm416_vm2, %v1417_v44, 0.0 }
 0x3b9   : > { %757 = vadd.xlane.f32.xlu0 %v756_v45 }
 0x3bb   : > { %v1419_v49 = vpop.eup %1418 }
 0x3bc   : > { %v924_v50 = vsel %vm416_vm2, %v1419_v49, 0.0 }
 0x3c6   : > { %763 = vrot.lane.b32.xlu1 %v1838_v12, %s1632_s27 }
 0x3cf   : > { %595 = vrot.lane.b32.xlu0 %v1838_v12, %s1631_s21 }
 0x3ea   : > { %925 = vadd.xlane.f32.xlu1 %v924_v50 }
 0x3fb   : > { %931 = vrot.lane.b32.xlu1 %v1838_v12, %s1633_s9 }
 0x43e   : > { %v589_v51 = vpop.xlane.xlu1 %588 }
 0x43f   : > { %1420 = vrcp.f32 %v589_v51 }
 0x442   : > { %v758_v52 = vpop.xlane.xlu0 %757  ;;  %v764_v56 = vpop.permute.xlu1 %763 }
 0x443   : > { %1422 = vrcp.f32 %v758_v52 }
 0x446   : > { %v596_v53 = vpop.permute.xlu0 %595 }
 0x447   : > { %1302 = vmatpush3.msra.mxu0 %v596_v53 }
 0x448   : > { %1311 = vmatprep.subr.mxu0 %v1629_v0 }
 0x44c   : > { %v1421_v54 = vpop.eup %1420 }
 0x44d   : > { %v591_v55 = vmul.f32 %v1421_v54, %v1415_v42 }
 0x44f   : > { %1252 = vst.msk [vmem:[%s1844_s23 + $0x8] sm:$0xff] %vm416_vm2, %v591_v55  ;;  %1304 = vmatmul.mubr.msk.f32.vlgmr.msra.gmra.mxu0 %vm416_vm2, %v591_v55 }
 0x450   : > { %v1423_v57 = vpop.eup %1422  ;;  %1312 = vmatpush3.msra.mxu0 %v764_v56  ;;  %1313 = vmatprep.mubr.msk.f32.mxu0 %vm1630_vm0, %v1629_v0 }
 0x451   : > { %v760_v58 = vmul.f32 %v1423_v57, %v1417_v44  ;;  %1321 = vmatprep.subr.mxu0 %v1629_v0 }
 0x453   : > { %1256 = vst.msk [vmem:[%s1844_s23 + $0x10] sm:$0xff] %vm416_vm2, %v760_v58  ;;  %1314 = vmatmul.mubr.msk.f32.vlgmr.msra.gmra.mxu0 %vm416_vm2, %v760_v58 }
 0x454   : > { %1323 = vmatprep.mubr.msk.f32.mxu0 %vm1630_vm0, %v1629_v0 }
 0x473   : > { %v926_v59 = vpop.xlane.xlu1 %925 }
 0x474   : > { %1424 = vrcp.f32 %v926_v59 }
 0x477   : > { %v932_v60 = vpop.permute.xlu1 %931 }
 0x478   : > { %1322 = vmatpush3.msra.mxu0 %v932_v60 }
 0x481   : > { %v1425_v61 = vpop.eup %1424 }
 0x482   : > { %v928_v62 = vmul.f32 %v1425_v61, %v1419_v49 }
 0x484   : > { %1260 = vst.msk [vmem:[%s1844_s23 + $0x18] sm:$0xff] %vm416_vm2, %v928_v62  ;;  %1324 = vmatmul.mubr.msk.f32.vlgmr.msra.gmra.mxu0 %vm416_vm2, %v928_v62 }
 0x50f   : > { %v667_v63 = vpop.f32.mrf.mxu0 }
 0x510   : > { %1008 = vrot.lane.b32.xlu0 %v667_v63, %s1633_s9 }
 0x511   : > { %v1305_v1 = vpop.f32.mrf.mxu0 }
 0x513   : > { %v835_v2 = vpop.f32.mrf.mxu0 }
 0x514   : > { %1012 = vrot.lane.b32.xlu1 %v835_v2, %s1632_s27 }
 0x515   : > { %v1315_v0 = vpop.f32.mrf.mxu0 }
 0x516   : > { %1523 = shalt.err (!%p1520_p12)
}
 0x517   : > { %s1524_s7 = scalar_lea.hbm %s1899_s10, 512  ;;  %s1528_s9 = scalar_lea.hbm %s1980_s4, 1024 }
 0x518   : > { %p1525_p1 = scmp.ne.s32.totalorder %s1899_s10, %s1524_s7  ;;  %p1529_p6 = scmp.lt.s32.totalorder %s1899_s10, %s1980_s4 }
 0x519   : > { %p1530_p7 = scmp.lt.s32.totalorder %s1528_s9, %s1524_s7 }
 0x51a   : > { %p1526_p2 = pnand %p1525_p1, %p1718_p9 }
 0x51b   : > { %p1531_p8 = por %p1530_p7, %p1529_p6 }
 0x51c   : > { %p1527_p5 = pneg %p1526_p2 }
 0x51e   : > { %p1532_p0 = pnand %p1531_p8, %p1527_p5 }
 0x520   : > { %1535 = shalt.err (!%p1532_p0)
}
 0x521   : > { %s1635_s23 = smov 128   ;;  %s1636_s5 = smov 8   ;;  %vm1020_vm3 = vcmask 523264   ;;  %vm1022_vm4 = vcmask 785408  }
 0x522   : > { %1333 = dma.vmem_to_hbm [thread:$0]  (%p1718_p9), %s1901_s13, 512, %s1899_s10, %s1031_s19, %s1635_s23, %s1635_s23, %s1636_s5  }
 0x523   : > { %s1264_s25 = sshll.u32 %s1616_s18, 7  ;;  %s326_s29 = scalar_lea.vmem [#allocation8], %s1805_s26 }
 0x524   : > { %s1046_s6 = sshll.u32 %s326_s29, 4  ;;  %s1934_s10 = scalar_lea.hbm %s1979_s3, %s1264_s25  ;;  %s1047_s6 = int_to_ptr.vmem [resolvable:$true] %s1046_s6 }
 0x525   : > { %s1536_s19 = scalar_lea.vmem %s1047_s6, 128  ;;  %s1637_s18 = smov [#allocation8]  }
 0x526   : > { %p1537_p3 = scmp.ne.s32.totalorder %s1047_s6, %s1536_s19  ;;  %s1540_s26 = sshll.u32 %s1637_s18, 4  ;;  %s1541_s26 = int_to_ptr.vmem [resolvable:$false] %s1540_s26 }
 0x527   : > { %s1542_s12 = scalar_lea.vmem %s1541_s26, 256  ;;  %p1543_p13 = scmp.lt.s32.totalorder %s1047_s6, %s1541_s26 }
 0x528   : > { %p1538_p4 = pnand %p1537_p3, %p1718_p9  ;;  %p1544_p12 = scmp.lt.s32.totalorder %s1542_s12, %s1536_s19 }
 0x52a   : > { %p1539_p10 = pneg %p1538_p4  ;;  %p1545_p1 = por %p1544_p12, %p1543_p13 }
 0x52c   : > { %p1546_p2 = pnand %p1545_p1, %p1539_p10 }
 0x544   : > { %v1003_v3 = vpop.f32.mrf.mxu0 }
 0x545   : > { %1016 = vrot.lane.b32.xlu0 %v1003_v3, %s1631_s21  ;;  %s1026_s21 = scalar_lea.sflag [#allocation4], %s1802_s24 }
 0x546   : > { %v1325_v4 = vpop.f32.mrf.mxu0 }
 0x582   : > { %v1009_v5 = vpop.permute.xlu0 %1008 }
 0x583   : > { %v1019_v7 = vsel %vm338_vm1, %v1863_v22, %v1009_v5 }
 0x586   : > { %v1013_v6 = vpop.permute.xlu1 %1012 }
 0x587   : > { %v1021_v8 = vsel %vm1020_vm3, %v1019_v7, %v1013_v6 }
 0x5b7   : > { %v1017_v9 = vpop.permute.xlu0 %1016 }
 0x5b8   : > { %v1023_v10 = vsel %vm1022_vm4, %v1021_v8, %v1017_v9 }
 0x5b9   : > { %1024 = vst [vmem:[%s326_s29] sm:$0xff] %v1023_v10 }
 0x5ba   : > { %1549 = shalt.err (!%p1546_p2)
}
 0x5bb   : > { %s1550_s1 = scalar_lea.hbm %s1934_s10, 128  ;;  %s1554_s22 = scalar_lea.hbm %s1979_s3, 256 }
 0x5bc   : > { %p1551_p5 = scmp.ne.s32.totalorder %s1934_s10, %s1550_s1  ;;  %p1555_p8 = scmp.lt.s32.totalorder %s1934_s10, %s1979_s3 }
 0x5bd   : > { %p1556_p0 = scmp.lt.s32.totalorder %s1554_s22, %s1550_s1 }
 0x5be   : > { %p1552_p6 = pnand %p1551_p5, %p1718_p9 }
 0x5bf   : > { %p1557_p3 = por %p1556_p0, %p1555_p8 }
 0x5c0   : > { %p1553_p7 = pneg %p1552_p6 }
 0x5c2   : > { %p1558_p4 = pnand %p1557_p3, %p1553_p7 }
 0x5c4   : > { %1561 = shalt.err (!%p1558_p4)
}
 0x5c5   : > { %1332 = dma.vmem_to_hbm [thread:$0]  (%p1718_p9), %s1047_s6, 128, %s1934_s10, %s1026_s21  }
 0x5c6 PF: > { %s1077_s14 = sand.u32 1, %s1604_s15   ;;  %p1996_p10 = scmp.ge.s32.totalorder %s1624_s20, 2 }
 0x5c7   : > { %s1078_s11 = scalar_lea.sflag [#allocation4], %s1077_s14 }
 0x5c8   : > { %p1347_p13 = pnand %p1996_p10, %p1725_p11 }
 0x5ca   : > { %p1348_p12 = pneg %p1347_p13 }
 0x5cc   : > { %1595 = dma.done.wait (%p1348_p12), %s1078_s11, 128  }
 0x5cd   : > { %1597 = vsyncadd (%p1348_p12), %s1078_s11, 4294967168  ;;  %s1087_s23 = scalar_lea.sflag [#allocation10], %s1077_s14 }
 0x5ce   : > { %1599 = dma.done.wait (%p1348_p12), %s1087_s23, 512  }
 0x5cf   : > { %1601 = vsyncadd (%p1348_p12), %s1087_s23, 4294966784  ;;  %s27_s20 = sadd.s32 1, %s1624_s20   ;;  %s1997_s28 = sld [smem:[#allocation17_spill]] }
 0x5d0   : > { %p24_p1 = scmp.ge.s32.totalorder %s27_s20, 4   ;;  %s1998_s18 = sld [smem:[#allocation15_spill]] }
 0x5d1   : > { %s1999_s19 = sld [smem:[#allocation16_spill]]  ;;  %s2000_s15 = smov %s1608_s16 }
 0x5d2   : > { %s2001_s16 = smov %s1612_s17  ;;  %26 = sbr.rel (!%p24_p1) target bundleno = 12 (0xc), region = 121 }
 0x5d5   : > { %s2002_s17 = smov %s1997_s28 }
 0x5d7   :  { %1092 = vsyncpa [#allocation3], 1 }
 0x5d8   :  { %1094 = vsyncpa [#allocation3 + $0x1], 1 }
 0x5d9   :  { %1095 = vsyncpa [#allocation6], 1 }
 0x5da   :  { %1097 = vsyncpa [#allocation6 + $0x1], 1 }
 0x5db   :  { %1098 = vsyncpa [#allocation4], 1 }
 0x5dc   :  { %1100 = vsyncpa [#allocation4 + $0x1], 1 }
 0x5dd   :  { %1101 = vsyncpa [#allocation10], 1 }
 0x5de   :  { %1103 = vsyncpa [#allocation10 + $0x1], 1 }

</bundles_post_ra>
